<compile_context>
chip_gen: v6e
topology: v6e:2x2x1
jax: 0.10.0
libtpu: 0.0.40
codegen_flags: <defaults>
</compile_context>

<pallas_src>
import functools

import jax
import jax.numpy as jnp
from jax.experimental import pallas as pl
from jax.experimental.pallas import tpu as pltpu

_LANE = 128
_SUBLANE = 8


def _distill_kl_block_kernel(ys_ref, yt_ref, out_ref, *, inv_T, batch, tile_b):
    # One (tile_b, C) block of student / teacher logits (full class axis).
    ys = ys_ref[...].astype(jnp.float32) * inv_T
    yt = yt_ref[...].astype(jnp.float32) * inv_T

    # Max-shifted logits for numerical stability.
    ys_shift = ys - jnp.max(ys, axis=-1, keepdims=True)
    yt_shift = yt - jnp.max(yt, axis=-1, keepdims=True)

    e_t = jnp.exp(yt_shift)
    z_t = jnp.sum(e_t, axis=-1, keepdims=True)                 # (tile_b, 1)
    z_s = jnp.sum(jnp.exp(ys_shift), axis=-1, keepdims=True)   # (tile_b, 1)

    # sum_c p_t * (log p_t - log p_s)
    #   = (1/z_t) * sum_c e_t * (yt_shift - ys_shift) + log z_s - log z_t
    cross = jnp.sum(e_t * (yt_shift - ys_shift), axis=-1, keepdims=True)
    kl_rows = cross / z_t + jnp.log(z_s) - jnp.log(z_t)        # (tile_b, 1)

    # Mask rows beyond the true batch (ragged last block / block larger than B).
    # Garbage rows may produce NaN/Inf, but all row reductions are per-row and
    # jnp.where is a select, so masked rows contribute exactly 0.
    row0 = pl.program_id(0) * tile_b
    row_ids = row0 + jax.lax.broadcasted_iota(jnp.int32, kl_rows.shape, 0)
    kl_rows = jnp.where(row_ids < batch, kl_rows, 0.0)

    # Lane-dense (1, 128) partial-sum slab; wrapper reads lane 0 of each block.
    out_ref[...] = jnp.full((1, _LANE), jnp.sum(kl_rows), dtype=jnp.float32)


def distill_kl(y_s, y_t, T=4.0, beta=1.0):
    """Pallas implementation of DistillKL.forward. Returns a scalar float32."""
    assert y_s.shape == y_t.shape and y_s.ndim == 2
    B, C = y_s.shape
    itemsize = jnp.dtype(y_s.dtype).itemsize

    # dtype-aware sublane packing for the batch-tile granularity
    # (f32 -> 8 rows, bf16 -> 16, int8/fp8 -> 32).
    sublane_pack = _SUBLANE * max(1, 4 // itemsize)

    # ---- VMEM-capacity-aware tile sizing (generation-aware) -----------------
    vmem_cap = 64 * 1024 * 1024                      # v7x physical fallback
    try:
        vmem_cap = int(pltpu.get_tpu_info().vmem_capacity_bytes)
    except Exception:
        pass
    budget = vmem_cap // 2                           # leave headroom

    # Per batch-row footprint: 2 inputs x 2 pipeline buffers (input dtype)
    # plus ~6 full-size f32 intermediates inside the kernel.
    per_row_bytes = 2 * 2 * C * itemsize + 6 * C * 4
    tile_b = budget // per_row_bytes

    # Keep a single input block <= ~8 MiB (DMA granularity / pipeline latency).
    tile_b = min(tile_b, (8 * 1024 * 1024) // max(1, C * itemsize))
    tile_b = max(sublane_pack, (tile_b // sublane_pack) * sublane_pack)

    # v7x has 2 TensorCores: make sure the "parallel" axis has >= 2 blocks
    # whenever the batch allows it (neutral on v5e/v6e).
    if B > sublane_pack:
        half_rows = pl.cdiv(pl.cdiv(B, 2), sublane_pack) * sublane_pack
        tile_b = min(tile_b, half_rows)

    if tile_b >= B:
        tile_b = B                                   # full array dim -> always legal
    num_blocks = pl.cdiv(B, tile_b)

    est_bytes = tile_b * per_row_bytes
    vmem_limit = int(min(vmem_cap - (4 << 20),
                         max(32 << 20, est_bytes + est_bytes // 2)))

    # TODO(synk): for vocab-scale C (>=128k) add a second "arbitrary" grid axis
    # over C with online logsumexp / running-sum accumulators in VMEM scratch
    # (and optionally MXU ones-matmul row sums) instead of one full-C block.

    kernel = functools.partial(
        _distill_kl_block_kernel, inv_T=1.0 / float(T), batch=B, tile_b=tile_b)

    cost = pl.CostEstimate(
        flops=int(10 * B * C),
        transcendentals=int(2 * B * C + 2 * B),
        bytes_accessed=int(2 * B * C * itemsize + num_blocks * _LANE * 4),
    )

    partial_slab = pl.pallas_call(
        kernel,
        out_shape=jax.ShapeDtypeStruct((1, num_blocks * _LANE), jnp.float32),
        grid=(num_blocks,),
        in_specs=[
            pl.BlockSpec((tile_b, C), lambda i: (i, 0)),
            pl.BlockSpec((tile_b, C), lambda i: (i, 0)),
        ],
        out_specs=pl.BlockSpec((1, _LANE), lambda i: (0, i)),
        compiler_params=pltpu.CompilerParams(
            dimension_semantics=("parallel",),       # independent blocks (v7x 2-TC)
            vmem_limit_bytes=vmem_limit,
        ),
        cost_estimate=cost,
    )(y_s, y_t)

    partials = partial_slab.reshape(num_blocks, _LANE)[:, 0]
    # Apply T^2 * beta / B exactly once, over the summed per-block partials.
    return jnp.sum(partials) * (float(T) * float(T) * float(beta) / float(B))


def _reference(y_s, y_t, T, beta):
    ys = y_s.astype(jnp.float32) / T
    yt = y_t.astype(jnp.float32) / T
    log_p_s = jax.nn.log_softmax(ys, axis=1)
    p_t = jax.nn.softmax(yt, axis=1)
    log_p_t = jax.nn.log_softmax(yt, axis=1)
    kl = jnp.sum(p_t * (log_p_t - log_p_s))
    return beta * kl * (T ** 2) / y_s.shape[0]


if __name__ == "__main__":
    key = jax.random.PRNGKey(0)
    k1, k2, k3, k4, k5, k6 = jax.random.split(key, 6)
    T, beta = 4.0, 1.0

    # Case 1: aligned small shapes, f32 logits.
    B, C = 8, 128
    y_s = jax.random.normal(k1, (B, C), dtype=jnp.float32)
    y_t = jax.random.normal(k2, (B, C), dtype=jnp.float32)
    loss = jax.block_until_ready(distill_kl(y_s, y_t, T=T, beta=beta))
    ref = _reference(y_s, y_t, T, beta)
    assert jnp.allclose(loss, ref, rtol=2e-3, atol=1e-4), (loss, ref)

    # Case 2: unaligned (B, C), bf16 logits — exercises full-C ragged block and
    # a batch smaller than the bf16 sublane packing (no wrapper padding).
    B2, C2 = 6, 100
    y_s2 = jax.random.normal(k3, (B2, C2), dtype=jnp.float32).astype(jnp.bfloat16)
    y_t2 = jax.random.normal(k4, (B2, C2), dtype=jnp.float32).astype(jnp.bfloat16)
    loss2 = jax.block_until_ready(distill_kl(y_s2, y_t2, T=T, beta=beta))
    ref2 = _reference(y_s2, y_t2, T, beta)
    assert jnp.allclose(loss2, ref2, rtol=5e-3, atol=1e-3), (loss2, ref2)

    # Case 3: multi-block grid with a ragged last batch block (in-kernel row mask).
    B3, C3 = 50, 100
    y_s3 = jax.random.normal(k5, (B3, C3), dtype=jnp.float32)
    y_t3 = jax.random.normal(k6, (B3, C3), dtype=jnp.float32)
    loss3 = jax.block_until_ready(distill_kl(y_s3, y_t3, T=T, beta=beta))
    ref3 = _reference(y_s3, y_t3, T, beta)
    assert jnp.allclose(loss3, ref3, rtol=2e-3, atol=1e-4), (loss3, ref3)

    print("KERNEL_OK")
</pallas_src>

<mosaic_0001>
module attributes {stable_mosaic.version = 11 : i64} {
  func.func @_distill_kl_block_kernel(%arg0: i32, %arg1: memref<8x128xf32, #tpu.memory_space<vmem>>, %arg2: memref<8x128xf32, #tpu.memory_space<vmem>>, %arg3: memref<1x128xf32, #tpu.memory_space<vmem>>) attributes {dimension_semantics = [#tpu.dimension_semantics<parallel>], iteration_bounds = array<i64: 1>, scalar_prefetch = 0 : i64, scratch_operands = 0 : i64, tpu.core_type = #tpu.core_type<tc>, window_params = [{transform_indices = @transform_0, window_bounds = array<i64: 8, 128>}, {transform_indices = @transform_1, window_bounds = array<i64: 8, 128>}, {transform_indices = @transform_2, window_bounds = array<i64: 1, 128>}]} {
    %c0 = arith.constant 0 : index
    %c0_0 = arith.constant 0 : index
    %0 = vector.load %arg1[%c0, %c0_0] : memref<8x128xf32, #tpu.memory_space<vmem>>, vector<8x128xf32>
    %cst = arith.constant 2.500000e-01 : f32
    %1 = vector.broadcast %cst : f32 to vector<8x128xf32>
    %2 = arith.mulf %0, %1 : vector<8x128xf32>
    %c0_1 = arith.constant 0 : index
    %c0_2 = arith.constant 0 : index
    %3 = vector.load %arg2[%c0_1, %c0_2] : memref<8x128xf32, #tpu.memory_space<vmem>>, vector<8x128xf32>
    %cst_3 = arith.constant 2.500000e-01 : f32
    %4 = vector.broadcast %cst_3 : f32 to vector<8x128xf32>
    %5 = arith.mulf %3, %4 : vector<8x128xf32>
    %cst_4 = arith.constant dense<0xFF800000> : vector<8xf32>
    %6 = vector.multi_reduction <maximumf>, %2, %cst_4 [1] : vector<8x128xf32> to vector<8xf32>
    %7 = vector.shape_cast %6 : vector<8xf32> to vector<8x1xf32>
    %8 = vector.broadcast %7 : vector<8x1xf32> to vector<8x128xf32>
    %9 = arith.subf %2, %8 : vector<8x128xf32>
    %cst_5 = arith.constant dense<0xFF800000> : vector<8xf32>
    %10 = vector.multi_reduction <maximumf>, %5, %cst_5 [1] : vector<8x128xf32> to vector<8xf32>
    %11 = vector.shape_cast %10 : vector<8xf32> to vector<8x1xf32>
    %12 = vector.broadcast %11 : vector<8x1xf32> to vector<8x128xf32>
    %13 = arith.subf %5, %12 : vector<8x128xf32>
    %14 = math.exp %13 : vector<8x128xf32>
    %cst_6 = arith.constant dense<0.000000e+00> : vector<8xf32>
    %15 = vector.multi_reduction <add>, %14, %cst_6 [1] : vector<8x128xf32> to vector<8xf32>
    %16 = vector.shape_cast %15 : vector<8xf32> to vector<8x1xf32>
    %17 = math.exp %9 : vector<8x128xf32>
    %cst_7 = arith.constant dense<0.000000e+00> : vector<8xf32>
    %18 = vector.multi_reduction <add>, %17, %cst_7 [1] : vector<8x128xf32> to vector<8xf32>
    %19 = vector.shape_cast %18 : vector<8xf32> to vector<8x1xf32>
    %20 = arith.subf %13, %9 : vector<8x128xf32>
    %21 = arith.mulf %14, %20 : vector<8x128xf32>
    %cst_8 = arith.constant dense<0.000000e+00> : vector<8xf32>
    %22 = vector.multi_reduction <add>, %21, %cst_8 [1] : vector<8x128xf32> to vector<8xf32>
    %23 = vector.shape_cast %22 : vector<8xf32> to vector<8x1xf32>
    %24 = arith.divf %23, %16 : vector<8x1xf32>
    %25 = math.log %19 : vector<8x1xf32>
    %26 = arith.addf %24, %25 : vector<8x1xf32>
    %27 = math.log %16 : vector<8x1xf32>
    %28 = arith.subf %26, %27 : vector<8x1xf32>
    %c8_i32 = arith.constant 8 : i32
    %29 = arith.muli %arg0, %c8_i32 : i32
    %30 = tpu.iota {dimensions = array<i32: 0>} : vector<8x1xi32>
    %31 = vector.broadcast %29 : i32 to vector<8x1xi32>
    %32 = arith.addi %31, %30 : vector<8x1xi32>
    %c8_i32_9 = arith.constant 8 : i32
    %33 = vector.broadcast %c8_i32_9 : i32 to vector<8x1xi32>
    %34 = arith.cmpi slt, %32, %33 : vector<8x1xi32>
    %cst_10 = arith.constant 0.000000e+00 : f32
    %35 = vector.broadcast %cst_10 : f32 to vector<8x1xf32>
    %36 = arith.select %34, %28, %35 : vector<8x1xi1>, vector<8x1xf32>
    %37 = vector.shape_cast %36 : vector<8x1xf32> to vector<1x8x1xf32>
    %cst_11 = arith.constant dense<0.000000e+00> : vector<1xf32>
    %38 = vector.multi_reduction <add>, %37, %cst_11 [1, 2] : vector<1x8x1xf32> to vector<1xf32>
    %39 = vector.shape_cast %38 : vector<1xf32> to vector<1x1x1xf32>
    %40 = vector.extract %39[0, 0, 0] : f32 from vector<1x1x1xf32>
    %41 = vector.broadcast %40 : f32 to vector<1x128xf32>
    %c0_12 = arith.constant 0 : index
    %c0_13 = arith.constant 0 : index
    %42 = vector.load %arg3[%c0_12, %c0_13] : memref<1x128xf32, #tpu.memory_space<vmem>>, vector<1x128xf32>
    tpu.vector_store %arg3[%c0_12, %c0_13], %41 {strides = array<i32>} : memref<1x128xf32, #tpu.memory_space<vmem>>, vector<1x128xf32>,
    return
  }
  func.func @transform_0(%arg0: i32) -> (i32, i32) {
    %c0_i32 = arith.constant 0 : i32
    %c0_i32_0 = arith.constant 0 : i32
    return %arg0, %c0_i32 : i32, i32
  }
  func.func @transform_1(%arg0: i32) -> (i32, i32) {
    %c0_i32 = arith.constant 0 : i32
    %c0_i32_0 = arith.constant 0 : i32
    return %arg0, %c0_i32 : i32, i32
  }
  func.func @transform_2(%arg0: i32) -> (i32, i32) {
    %c0_i32 = arith.constant 0 : i32
    %c0_i32_0 = arith.constant 0 : i32
    return %c0_i32, %arg0 : i32, i32
  }
}

</mosaic_0001>

<bundles_post_ra>
// kernel: tpu_custom_call.1
= control target key start
LH: loop header
LB: loop body
LE: loop exit
PB: predicated region body
PF: predicated region fallthrough
CT: control target
= control target key end

     0   :  { %7 = vsyncpa [#allocation3], 0  ;;  %s210_s0 = inlined_call_operand.hbm [shape: f32[8,128], index: 0, kind: input, shape index: {}]   ;;  %s211_s1 = inlined_call_operand.hbm [shape: f32[8,128], index: 1, kind: input, shape index: {}]   ;;  %s212_s2 = inlined_call_operand.hbm [shape: f32[1,128], index: 2, kind: output, shape index: {}]  }
   0x1   :  { %8 = vsyncpa [#allocation6], 0 }
   0x2   :  { %9 = vsyncpa [#allocation4], 0  ;;  %s183_s9 = smov [#allocation2]   ;;  %s184_s11 = smov [#allocation5]  }
   0x3   :  { %s16_s10 = sshll.u32 %s183_s9, 4  ;;  %s26_s12 = sshll.u32 %s184_s11, 4  ;;  %s17_s10 = int_to_ptr.vmem [resolvable:$true] %s16_s10  ;;  %s27_s12 = int_to_ptr.vmem [resolvable:$true] %s26_s12 }
   0x4   :  { %s125_s13 = scalar_lea.vmem %s17_s10, 128  ;;  %p130_p1 = scmp.lt.s32.totalorder %s17_s10, %s17_s10 }
   0x5   :  { %p126_p0 = scmp.ne.s32.totalorder %s17_s10, %s125_s13  ;;  %p131_p2 = scmp.lt.s32.totalorder %s125_s13, %s125_s13 }
   0x7   :  { %p132_p3 = por %p131_p2, %p130_p1 }
   0x9   :  { %p133_p4 = pnand %p132_p3, %p126_p0 }
   0xb   :  { %136 = shalt.err (!%p133_p4)
}
   0xc   :  { %19 = dma.hbm_to_vmem [thread:$0]  %s210_s0, 128, %s17_s10, [#allocation3]  }
   0xd   :  { %s145_s16 = scalar_lea.vmem %s27_s12, 128  ;;  %p150_p6 = scmp.lt.s32.totalorder %s27_s12, %s27_s12 }
   0xe   :  { %p146_p5 = scmp.ne.s32.totalorder %s27_s12, %s145_s16  ;;  %p151_p7 = scmp.lt.s32.totalorder %s145_s16, %s145_s16 }
  0x10   :  { %p152_p8 = por %p151_p7, %p150_p6 }
  0x12   :  { %p153_p9 = pnand %p152_p8, %p146_p5 }
  0x14   :  { %156 = shalt.err (!%p153_p9)
}
  0x15   :  { %29 = dma.hbm_to_vmem [thread:$0]  %s211_s1, 128, %s27_s12, [#allocation6]  }
  0x16   :  { %177 = dma.done.wait [#allocation3], 128  }
  0x17   :  { %178 = vsyncadd [#allocation3], 4294967168 }
  0x18   :  { %179 = dma.done.wait [#allocation6], 128  }
  0x19   :  { %180 = vsyncadd [#allocation6], 4294967168  ;;  %v36_v0 = vld [vmem:[#allocation2] sm:$0xff]  ;;  %v38_v1 = vld [vmem:[#allocation5] sm:$0xff]  ;;  %vm73_vm0 = vcmask 7168   ;;  %s185_s0 = smov [#allocation7]  }
  0x1a   :  { %v37_v2 = vmul.f32 0.25, %v36_v0  ;;  %v39_v3 = vmul.f32 0.25, %v38_v1  ;;  %s92_s1 = sshll.u32 %s185_s0, 4  ;;  %s93_s1 = int_to_ptr.vmem [resolvable:$true] %s92_s1 }
  0x1b   :  { %s157_s20 = scalar_lea.vmem %s93_s1, 16  ;;  %s161_s21 = scalar_lea.vmem %s93_s1, 32 }
  0x1c   :  { %40 = vmax.xlane.f32.xlu0 %v37_v2  ;;  %p158_p10 = scmp.ne.s32.totalorder %s93_s1, %s157_s20  ;;  %p162_p11 = scmp.lt.s32.totalorder %s93_s1, %s93_s1 }
  0x1d   :  { %p163_p12 = scmp.lt.s32.totalorder %s161_s21, %s157_s20 }
  0x1f   :  { %p164_p13 = por %p163_p12, %p162_p11 }
  0x20   :  { %43 = vmax.xlane.f32.xlu0 %v39_v3 }
  0x21   :  { %p165_p0 = pnand %p164_p13, %p158_p10 }
  0xa5   :  { %v41_v4 = vpop.xlane.xlu0 %40 }
  0xa6   :  { %v42_v6 = vsub.f32 %v37_v2, %v41_v4 }
  0xa8   :  { %v50_v9 = vmul.f32 1.442695, %v42_v6 }
  0xa9   :  { %v44_v5 = vpop.xlane.xlu0 %43 }
  0xaa   :  { %v45_v7 = vsub.f32 %v39_v3, %v44_v5 }
  0xac   :  { %v46_v8 = vmul.f32 1.442695, %v45_v7  ;;  %v54_v10 = vsub.f32 %v45_v7, %v42_v6 }
  0xae   :  { %107 = vpow2.f32 %v46_v8 }
  0xaf   :  { %109 = vpow2.f32 %v50_v9 }
  0xbb   :  { %v108_v11 = vpop.eup %107 }
  0xbc   :  { %48 = vadd.xlane.f32.xlu1 %v108_v11  ;;  %v55_v12 = vmul.f32 %v108_v11, %v54_v10  ;;  %v110_v13 = vpop.eup %109 }
  0xbe   :  { %56 = vadd.xlane.f32.xlu0 %v55_v12 }
  0xc0   :  { %52 = vadd.xlane.f32.xlu1 %v110_v13 }
 0x145   :  { %v49_v14 = vpop.xlane.xlu1 %48 }
 0x146   :  { %111 = vrcp.f32 %v49_v14 }
 0x147   :  { %113 = vlog2.f32 %v49_v14  ;;  %v57_v19 = vpop.xlane.xlu0 %56 }
 0x149   :  { %v53_v15 = vpop.xlane.xlu1 %52 }
 0x14a   :  { %115 = vlog2.f32 %v53_v15 }
 0x153   :  { %v112_v16 = vpop.eup %111 }
 0x154   :  { %v114_v17 = vpop.eup %113  ;;  %v59_v20 = vmul.f32 %v112_v16, %v57_v19 }
 0x155   :  { %v64_v23 = vmul.f32 0.6931472, %v114_v17 }
 0x157   :  { %v116_v18 = vpop.eup %115 }
 0x158   :  { %v61_v21 = vmul.f32 0.6931472, %v116_v18 }
 0x15a   :  { %v62_v22 = vadd.f32 %v61_v21, %v59_v20 }
 0x15c   :  { %v65_v24 = vsub.f32 %v62_v22, %v64_v23 }
 0x15e   :  { %v74_v25 = vsel %vm73_vm0, %v65_v24, 0.0 }
 0x15f   :  { %75 = vadd.xlane.f32.xlu1 %v74_v25 }
 0x1e8   :  { %v76_v26 = vpop.xlane.xlu1 %75 }
 0x1e9   :  { %v77_v27 = vrot.slane %v76_v26, 4 }
 0x1eb   :  { %v78_v28 = vadd.f32 %v77_v27, %v76_v26 }
 0x1ed   :  { %v79_v29 = vrot.slane %v78_v28, 2 }
 0x1ef   :  { %v80_v30 = vadd.f32 %v79_v29, %v78_v28 }
 0x1f1   :  { %v81_v31 = vrot.slane %v80_v30, 1 }
 0x1f3   :  { %v82_v32 = vadd.f32 %v81_v31, %v80_v30 }
 0x1f5   :  { %102 = vpush %v82_v32 }
 0x226   :  { %s103_s19 = spop %102 }
 0x227   :  { %v84_v33 = vstv %s103_s19 }
 0x228   :  { %85 = vst [vmem:[#allocation7] sm:$0x1] %v84_v33 }
 0x229   :  { %168 = shalt.err (!%p165_p0)
}
 0x22a   :  { %95 = dma.vmem_to_hbm [thread:$0]  %s93_s1, 16, %s212_s2, [#allocation4]  }
 0x22b   :  { %181 = dma.done.wait [#allocation4], 16  }
 0x22c   :  { %182 = vsyncadd [#allocation4], 4294967280 }
 0x22d   :  { %99 = vsyncpa [#allocation3], 1 }
 0x22e   :  { %100 = vsyncpa [#allocation6], 1 }
 0x22f   :  { %101 = vsyncpa [#allocation4], 1 }

</bundles_post_ra>
